<compile_context>
chip_gen: v5e
topology: v5e:2x2
jax: 0.10.0
libtpu: 0.0.40
codegen_flags: <defaults>
</compile_context>

<pallas_src>
import functools

import jax
import jax.numpy as jnp
from jax.experimental import pallas as pl
from jax.experimental.pallas import tpu as pltpu

_IN = 28 * 28          # 784
_H1 = 128
_H2 = 64
_OUT = 10
_TILE_B_MAX = 2048     # rows per grid step (sweepable; multiple of 8)


def _round_up(n, m):
    return ((n + m - 1) // m) * m


def _mlp_kernel(x_ref, w1_ref, b1_ref, w2_ref, b2_ref, w3_ref, b3_ref, o_ref):
    # Cast x to the (possibly bf16) weight dtype in-kernel; DMA carried the
    # caller's dtype so no extra wrapper-side convert pass is needed.
    x = x_ref[...].astype(w1_ref.dtype)
    # fc1 + relu (f32 accumulation on the MXU)
    h1 = jnp.dot(x, w1_ref[...], preferred_element_type=jnp.float32)
    h1 = jnp.maximum(h1 + b1_ref[...], 0.0)
    # fc2 + relu
    h1 = h1.astype(w2_ref.dtype)
    h2 = jnp.dot(h1, w2_ref[...], preferred_element_type=jnp.float32)
    h2 = jnp.maximum(h2 + b2_ref[...], 0.0)
    # fc3 (no activation)
    h2 = h2.astype(w3_ref.dtype)
    out = jnp.dot(h2, w3_ref[...], preferred_element_type=jnp.float32)
    o_ref[...] = (out + b3_ref[...]).astype(o_ref.dtype)


@functools.partial(jax.jit, static_argnames=("compute_dtype",))
def mnist_net_forward(x_nchw, w1, b1, w2, b2, w3, b3, *, compute_dtype=jnp.float32):
    """Forward pass of the PyTorch `Net` module.

    x_nchw : [B, 1, 28, 28] float32 (any float dtype; cast happens in-kernel)
    w1     : [784, 128]  (transposed PyTorch fc1.weight)
    b1     : [128] or [1, 128]
    w2     : [128, 64],  b2 : [64]  or [1, 64]
    w3     : [64, 10],   b3 : [10]  or [1, 10]
    compute_dtype : dtype of the matmul *weight* operands (f32 or bf16).
                    Accumulation / biases / ReLU stay float32.  On the bf16
                    path the intermediate activations h1/h2 are also rounded
                    to bf16 between layers.
    returns: [B, 10] float32 logits
    """
    B = x_nchw.shape[0]
    x = x_nchw.reshape(B, _IN)  # == x.view(-1, 784); keep incoming dtype

    cdt = jnp.dtype(compute_dtype)

    # Batch: pad only to a sublane multiple of 8 (no tile-sized zero padding).
    B8 = _round_up(max(B, 1), 8)
    if B8 != B:
        x = jnp.pad(x, ((0, B8 - B), (0, 0)))

    # Tile size: big enough to amortize the ~0.35us per-grid-step overhead,
    # capped at ~ceil(B8/2) so the parallel axis gives >=2 tiles (megacore).
    tile_b = max(8, min(_TILE_B_MAX, _round_up(pl.cdiv(B8, 2), 8)))
    n_tiles = pl.cdiv(B8, tile_b)   # last tile may be ragged; wrapper slices [:B]

    # Weights/biases: natural (unpadded) shapes; tiny, VMEM-resident.
    w1_c = w1.astype(cdt)
    b1_c = b1.reshape(1, _H1).astype(jnp.float32)
    w2_c = w2.astype(cdt)
    b2_c = b2.reshape(1, _H2).astype(jnp.float32)
    w3_c = w3.astype(cdt)
    b3_c = b3.reshape(1, _OUT).astype(jnp.float32)

    x_itemsize = jnp.dtype(x.dtype).itemsize
    w_bytes = (_IN * _H1 + _H1 * _H2 + _H2 * _OUT) * cdt.itemsize
    cost = pl.CostEstimate(
        flops=2 * B8 * (_IN * _H1 + _H1 * _H2 + _H2 * _OUT),
        transcendentals=0,
        bytes_accessed=B8 * _IN * x_itemsize + w_bytes + B8 * _OUT * 4,
    )

    out = pl.pallas_call(
        _mlp_kernel,
        out_shape=jax.ShapeDtypeStruct((B8, _OUT), jnp.float32),
        grid=(n_tiles,),
        in_specs=[
            # x: tiled over batch; full 784 last dim (block dim == array dim).
            pl.BlockSpec((tile_b, _IN), lambda i: (i, 0)),
            # weights / biases: constant index maps -> resident in VMEM.
            pl.BlockSpec((_IN, _H1), lambda i: (0, 0)),
            pl.BlockSpec((1, _H1), lambda i: (0, 0)),
            pl.BlockSpec((_H1, _H2), lambda i: (0, 0)),
            pl.BlockSpec((1, _H2), lambda i: (0, 0)),
            pl.BlockSpec((_H2, _OUT), lambda i: (0, 0)),
            pl.BlockSpec((1, _OUT), lambda i: (0, 0)),
        ],
        out_specs=pl.BlockSpec((tile_b, _OUT), lambda i: (i, 0)),
        compiler_params=pltpu.CompilerParams(
            dimension_semantics=("parallel",),
            vmem_limit_bytes=40 * 1024 * 1024,
        ),
        cost_estimate=cost,
    )(x, w1_c, b1_c, w2_c, b2_c, w3_c, b3_c)

    # Strip batch padding / ragged-tile garbage rows (keep this slice!).
    if B8 != B:
        out = out[:B]
    return out


def _init_linear(key, in_features, out_features):
    """PyTorch nn.Linear default init (uniform +-1/sqrt(fan_in)); weight transposed."""
    kw, kb = jax.random.split(key)
    bound = 1.0 / jnp.sqrt(jnp.float32(in_features))
    w = jax.random.uniform(kw, (in_features, out_features), jnp.float32,
                           minval=-bound, maxval=bound)
    b = jax.random.uniform(kb, (1, out_features), jnp.float32,
                           minval=-bound, maxval=bound)
    return w, b


def _reference_forward(x_nchw, w1, b1, w2, b2, w3, b3):
    x = x_nchw.reshape(x_nchw.shape[0], _IN).astype(jnp.float32)
    h1 = jnp.maximum(x @ w1 + b1, 0.0)
    h2 = jnp.maximum(h1 @ w2 + b2, 0.0)
    return h2 @ w3 + b3


if __name__ == "__main__":
    key = jax.random.PRNGKey(0)
    kx, k1, k2, k3, kx2 = jax.random.split(key, 5)

    w1, b1 = _init_linear(k1, _IN, _H1)
    w2, b2 = _init_linear(k2, _H1, _H2)
    w3, b3 = _init_linear(k3, _H2, _OUT)

    # Small batch (single tile).
    B = 8
    x = jax.random.normal(kx, (B, 1, 28, 28), jnp.float32)
    ref = _reference_forward(x, w1, b1, w2, b2, w3, b3)

    out = mnist_net_forward(x, w1, b1, w2, b2, w3, b3, compute_dtype=jnp.float32)
    out = jax.block_until_ready(out)
    assert out.shape == (B, 10)
    assert jnp.allclose(out, ref, atol=1e-4, rtol=1e-4), "f32 mismatch vs reference"

    # bf16-weight path (f32 accumulate; x cast in-kernel).
    out_bf16 = mnist_net_forward(x, w1, b1, w2, b2, w3, b3, compute_dtype=jnp.bfloat16)
    out_bf16 = jax.block_until_ready(out_bf16)
    assert jnp.allclose(out_bf16, ref, atol=2e-1, rtol=5e-2), "bf16 mismatch vs reference"

    # Non-multiple-of-8 batch across two tiles (exercises pad + ragged slice).
    B2 = 300
    x2 = jax.random.normal(kx2, (B2, 1, 28, 28), jnp.float32)
    ref2 = _reference_forward(x2, w1, b1, w2, b2, w3, b3)
    out2 = jax.block_until_ready(
        mnist_net_forward(x2, w1, b1, w2, b2, w3, b3, compute_dtype=jnp.float32))
    assert out2.shape == (B2, 10)
    assert jnp.allclose(out2, ref2, atol=1e-4, rtol=1e-4), "ragged-batch mismatch"

    print("KERNEL_OK")
</pallas_src>

<mosaic_0001>
module attributes {stable_mosaic.version = 11 : i64} {
  func.func @_mlp_kernel(%arg0: i32, %arg1: memref<8x784xf32, #tpu.memory_space<vmem>>, %arg2: memref<784x128xf32, #tpu.memory_space<vmem>>, %arg3: memref<1x128xf32, #tpu.memory_space<vmem>>, %arg4: memref<128x64xf32, #tpu.memory_space<vmem>>, %arg5: memref<1x64xf32, #tpu.memory_space<vmem>>, %arg6: memref<64x10xf32, #tpu.memory_space<vmem>>, %arg7: memref<1x10xf32, #tpu.memory_space<vmem>>, %arg8: memref<8x10xf32, #tpu.memory_space<vmem>>) attributes {dimension_semantics = [#tpu.dimension_semantics<parallel>], iteration_bounds = array<i64: 1>, scalar_prefetch = 0 : i64, scratch_operands = 0 : i64, tpu.core_type = #tpu.core_type<tc>, window_params = [{transform_indices = @transform_0, window_bounds = array<i64: 8, 784>}, {pipeline_mode = #tpu.pipeline_mode<synchronous>, transform_indices = @transform_1, window_bounds = array<i64: 784, 128>}, {pipeline_mode = #tpu.pipeline_mode<synchronous>, transform_indices = @transform_2, window_bounds = array<i64: 1, 128>}, {pipeline_mode = #tpu.pipeline_mode<synchronous>, transform_indices = @transform_3, window_bounds = array<i64: 128, 64>}, {pipeline_mode = #tpu.pipeline_mode<synchronous>, transform_indices = @transform_4, window_bounds = array<i64: 1, 64>}, {pipeline_mode = #tpu.pipeline_mode<synchronous>, transform_indices = @transform_5, window_bounds = array<i64: 64, 10>}, {pipeline_mode = #tpu.pipeline_mode<synchronous>, transform_indices = @transform_6, window_bounds = array<i64: 1, 10>}, {transform_indices = @transform_7, window_bounds = array<i64: 8, 10>}]} {
    %c0 = arith.constant 0 : index
    %c0_0 = arith.constant 0 : index
    %0 = vector.load %arg1[%c0, %c0_0] : memref<8x784xf32, #tpu.memory_space<vmem>>, vector<8x784xf32>
    %c0_1 = arith.constant 0 : index
    %c0_2 = arith.constant 0 : index
    %1 = vector.load %arg2[%c0_1, %c0_2] : memref<784x128xf32, #tpu.memory_space<vmem>>, vector<784x128xf32>
    %cst = arith.constant dense<0.000000e+00> : vector<8x128xf32>
    %2 = tpu.matmul %0, %1, %cst {dimension_numbers = #tpu.dot_dimension_numbers<[1], [0], [0], [1], [0, 0, 1, 1], [], []>} : vector<8x784xf32>, vector<784x128xf32>, vector<8x128xf32> -> vector<8x128xf32>
    %c0_3 = arith.constant 0 : index
    %c0_4 = arith.constant 0 : index
    %3 = vector.load %arg3[%c0_3, %c0_4] : memref<1x128xf32, #tpu.memory_space<vmem>>, vector<1x128xf32>
    %4 = vector.broadcast %3 : vector<1x128xf32> to vector<8x128xf32>
    %5 = arith.addf %2, %4 : vector<8x128xf32>
    %cst_5 = arith.constant 0.000000e+00 : f32
    %6 = vector.broadcast %cst_5 : f32 to vector<8x128xf32>
    %7 = arith.maximumf %5, %6 : vector<8x128xf32>
    %c0_6 = arith.constant 0 : index
    %c0_7 = arith.constant 0 : index
    %8 = vector.load %arg4[%c0_6, %c0_7] : memref<128x64xf32, #tpu.memory_space<vmem>>, vector<128x64xf32>
    %cst_8 = arith.constant dense<0.000000e+00> : vector<8x64xf32>
    %9 = tpu.matmul %7, %8, %cst_8 {dimension_numbers = #tpu.dot_dimension_numbers<[1], [0], [0], [1], [0, 0, 1, 1], [], []>} : vector<8x128xf32>, vector<128x64xf32>, vector<8x64xf32> -> vector<8x64xf32>
    %c0_9 = arith.constant 0 : index
    %c0_10 = arith.constant 0 : index
    %10 = vector.load %arg5[%c0_9, %c0_10] : memref<1x64xf32, #tpu.memory_space<vmem>>, vector<1x64xf32>
    %11 = vector.broadcast %10 : vector<1x64xf32> to vector<8x64xf32>
    %12 = arith.addf %9, %11 : vector<8x64xf32>
    %cst_11 = arith.constant 0.000000e+00 : f32
    %13 = vector.broadcast %cst_11 : f32 to vector<8x64xf32>
    %14 = arith.maximumf %12, %13 : vector<8x64xf32>
    %c0_12 = arith.constant 0 : index
    %c0_13 = arith.constant 0 : index
    %15 = vector.load %arg6[%c0_12, %c0_13] : memref<64x10xf32, #tpu.memory_space<vmem>>, vector<64x10xf32>
    %cst_14 = arith.constant dense<0.000000e+00> : vector<8x10xf32>
    %16 = tpu.matmul %14, %15, %cst_14 {dimension_numbers = #tpu.dot_dimension_numbers<[1], [0], [0], [1], [0, 0, 1, 1], [], []>} : vector<8x64xf32>, vector<64x10xf32>, vector<8x10xf32> -> vector<8x10xf32>
    %c0_15 = arith.constant 0 : index
    %c0_16 = arith.constant 0 : index
    %17 = vector.load %arg7[%c0_15, %c0_16] : memref<1x10xf32, #tpu.memory_space<vmem>>, vector<1x10xf32>
    %18 = vector.broadcast %17 : vector<1x10xf32> to vector<8x10xf32>
    %19 = arith.addf %16, %18 : vector<8x10xf32>
    %c0_17 = arith.constant 0 : index
    %c0_18 = arith.constant 0 : index
    %20 = vector.load %arg8[%c0_17, %c0_18] : memref<8x10xf32, #tpu.memory_space<vmem>>, vector<8x10xf32>
    tpu.vector_store %arg8[%c0_17, %c0_18], %19 {strides = array<i32>} : memref<8x10xf32, #tpu.memory_space<vmem>>, vector<8x10xf32>,
    return
  }
  func.func @transform_0(%arg0: i32) -> (i32, i32) {
    %c0_i32 = arith.constant 0 : i32
    %c0_i32_0 = arith.constant 0 : i32
    return %arg0, %c0_i32 : i32, i32
  }
  func.func @transform_1(%arg0: i32) -> (i32, i32) {
    %c0_i32 = arith.constant 0 : i32
    %c0_i32_0 = arith.constant 0 : i32
    %c0_i32_1 = arith.constant 0 : i32
    return %c0_i32, %c0_i32_0 : i32, i32
  }
  func.func @transform_2(%arg0: i32) -> (i32, i32) {
    %c0_i32 = arith.constant 0 : i32
    %c0_i32_0 = arith.constant 0 : i32
    %c0_i32_1 = arith.constant 0 : i32
    return %c0_i32, %c0_i32_0 : i32, i32
  }
  func.func @transform_3(%arg0: i32) -> (i32, i32) {
    %c0_i32 = arith.constant 0 : i32
    %c0_i32_0 = arith.constant 0 : i32
    %c0_i32_1 = arith.constant 0 : i32
    return %c0_i32, %c0_i32_0 : i32, i32
  }
  func.func @transform_4(%arg0: i32) -> (i32, i32) {
    %c0_i32 = arith.constant 0 : i32
    %c0_i32_0 = arith.constant 0 : i32
    %c0_i32_1 = arith.constant 0 : i32
    return %c0_i32, %c0_i32_0 : i32, i32
  }
  func.func @transform_5(%arg0: i32) -> (i32, i32) {
    %c0_i32 = arith.constant 0 : i32
    %c0_i32_0 = arith.constant 0 : i32
    %c0_i32_1 = arith.constant 0 : i32
    return %c0_i32, %c0_i32_0 : i32, i32
  }
  func.func @transform_6(%arg0: i32) -> (i32, i32) {
    %c0_i32 = arith.constant 0 : i32
    %c0_i32_0 = arith.constant 0 : i32
    %c0_i32_1 = arith.constant 0 : i32
    return %c0_i32, %c0_i32_0 : i32, i32
  }
  func.func @transform_7(%arg0: i32) -> (i32, i32) {
    %c0_i32 = arith.constant 0 : i32
    %c0_i32_0 = arith.constant 0 : i32
    return %arg0, %c0_i32 : i32, i32
  }
}

</mosaic_0001>

<bundles_post_ra>
// kernel: mnist_net_forward.1
= control target key start
LH: loop header
LB: loop body
LE: loop exit
PB: predicated region body
PF: predicated region fallthrough
CT: control target
= control target key end

     0   :  { %s848_s0 = inlined_call_operand.vmem [shape: f32[8,784], index: 0, kind: input, shape index: {}]   ;;  %s849_s1 = inlined_call_operand.vmem [shape: f32[784,128], index: 1, kind: input, shape index: {}]   ;;  %s850_s2 = inlined_call_operand.vmem [shape: f32[1,128], index: 2, kind: input, shape index: {}]   ;;  %s851_s3 = inlined_call_operand.vmem [shape: f32[128,64], index: 3, kind: input, shape index: {}]   ;;  %s852_s4 = inlined_call_operand.vmem [shape: f32[1,64], index: 4, kind: input, shape index: {}]   ;;  %s853_s5 = inlined_call_operand.vmem [shape: f32[64,10], index: 5, kind: input, shape index: {}]   ;;  %s854_s6 = inlined_call_operand.vmem [shape: f32[1,10], index: 6, kind: input, shape index: {}]   ;;  %s855_s7 = inlined_call_operand.hbm [shape: f32[8,10], index: 7, kind: output, shape index: {}]  }
   0x1   :  { %v49_v0 = vld [vmem:[%s849_s1 + $0x78] sm:$0xff]  ;;  %v48_v1 = vld [vmem:[%s849_s1 + $0x70] sm:$0xff]  ;;  %v47_v4 = vld [vmem:[%s849_s1 + $0x68] sm:$0xff] }
   0x2   :  { %v65_v2 = vld [vmem:[%s849_s1 + $0xf8] sm:$0xff]  ;;  %140 = vmatpush.msra.mxu0 %v49_v0  ;;  %v64_v3 = vld [vmem:[%s849_s1 + $0xf0] sm:$0xff]  ;;  %v63_v5 = vld [vmem:[%s849_s1 + $0xe8] sm:$0xff] }
   0x3   :  { %160 = vmatpush.msra.mxu1 %v65_v2  ;;  %v46_v6 = vld [vmem:[%s849_s1 + $0x60] sm:$0xff]  ;;  %v45_v8 = vld [vmem:[%s849_s1 + $0x58] sm:$0xff]  ;;  %v44_v10 = vld [vmem:[%s849_s1 + $0x50] sm:$0xff] }
   0x4   :  { %141 = vmatpush.msra.mxu0 %v48_v1  ;;  %v62_v7 = vld [vmem:[%s849_s1 + $0xe0] sm:$0xff]  ;;  %v61_v9 = vld [vmem:[%s849_s1 + $0xd8] sm:$0xff]  ;;  %v60_v12 = vld [vmem:[%s849_s1 + $0xd0] sm:$0xff] }
   0x5   :  { %161 = vmatpush.msra.mxu1 %v64_v3  ;;  %v81_v11 = vld [vmem:[%s849_s1 + $0x178] sm:$0xff]  ;;  %v80_v13 = vld [vmem:[%s849_s1 + $0x170] sm:$0xff]  ;;  %v79_v15 = vld [vmem:[%s849_s1 + $0x168] sm:$0xff] }
   0x6   :  { %142 = vmatpush.msra.mxu0 %v47_v4  ;;  %180 = vmatpush.msra.mxu2 %v81_v11  ;;  %v97_v14 = vld [vmem:[%s849_s1 + $0x1f8] sm:$0xff]  ;;  %v96_v16 = vld [vmem:[%s849_s1 + $0x1f0] sm:$0xff]  ;;  %v43_v17 = vld [vmem:[%s849_s1 + $0x48] sm:$0xff] }
   0x7   :  { %162 = vmatpush.msra.mxu1 %v63_v5  ;;  %v59_v18 = vld [vmem:[%s849_s1 + $0xc8] sm:$0xff]  ;;  %200 = vmatpush.msra.mxu3 %v97_v14  ;;  %v78_v19 = vld [vmem:[%s849_s1 + $0x160] sm:$0xff]  ;;  %v77_v23 = vld [vmem:[%s849_s1 + $0x158] sm:$0xff] }
   0x8   :  { %143 = vmatpush.msra.mxu0 %v46_v6  ;;  %181 = vmatpush.msra.mxu2 %v80_v13  ;;  %v95_v20 = vld [vmem:[%s849_s1 + $0x1e8] sm:$0xff]  ;;  %v42_v21 = vld [vmem:[%s849_s1 + $0x40] sm:$0xff]  ;;  %v41_v25 = vld [vmem:[%s849_s1 + $0x38] sm:$0xff] }
   0x9   :  { %163 = vmatpush.msra.mxu1 %v62_v7  ;;  %v58_v22 = vld [vmem:[%s849_s1 + $0xc0] sm:$0xff]  ;;  %201 = vmatpush.msra.mxu3 %v96_v16  ;;  %v57_v26 = vld [vmem:[%s849_s1 + $0xb8] sm:$0xff]  ;;  %v76_v27 = vld [vmem:[%s849_s1 + $0x150] sm:$0xff] }
   0xa   :  { %144 = vmatpush.msra.mxu0 %v45_v8  ;;  %182 = vmatpush.msra.mxu2 %v79_v15  ;;  %v94_v24 = vld [vmem:[%s849_s1 + $0x1e0] sm:$0xff]  ;;  %v93_v28 = vld [vmem:[%s849_s1 + $0x1d8] sm:$0xff]  ;;  %v40_v29 = vld [vmem:[%s849_s1 + $0x30] sm:$0xff] }
   0xb   :  { %164 = vmatpush.msra.mxu1 %v61_v9  ;;  %202 = vmatpush.msra.mxu3 %v95_v20  ;;  %v56_v30 = vld [vmem:[%s849_s1 + $0xb0] sm:$0xff]  ;;  %v75_v31 = vld [vmem:[%s849_s1 + $0x148] sm:$0xff]  ;;  %v74_v35 = vld [vmem:[%s849_s1 + $0x140] sm:$0xff] }
   0xc   :  { %145 = vmatpush.msra.mxu0 %v44_v10  ;;  %183 = vmatpush.msra.mxu2 %v78_v19  ;;  %v92_v32 = vld [vmem:[%s849_s1 + $0x1d0] sm:$0xff]  ;;  %v39_v33 = vld [vmem:[%s849_s1 + $0x28] sm:$0xff]  ;;  %v38_v37 = vld [vmem:[%s849_s1 + $0x20] sm:$0xff] }
   0xd   :  { %165 = vmatpush.msra.mxu1 %v60_v12  ;;  %203 = vmatpush.msra.mxu3 %v94_v24  ;;  %v55_v34 = vld [vmem:[%s849_s1 + $0xa8] sm:$0xff]  ;;  %v54_v38 = vld [vmem:[%s849_s1 + $0xa0] sm:$0xff]  ;;  %v73_v39 = vld [vmem:[%s849_s1 + $0x138] sm:$0xff] }
   0xe   :  { %146 = vmatpush.msra.mxu0 %v43_v17  ;;  %184 = vmatpush.msra.mxu2 %v77_v23  ;;  %v91_v36 = vld [vmem:[%s849_s1 + $0x1c8] sm:$0xff]  ;;  %v90_v40 = vld [vmem:[%s849_s1 + $0x1c0] sm:$0xff]  ;;  %v37_v41 = vld [vmem:[%s849_s1 + $0x18] sm:$0xff] }
   0xf   :  { %166 = vmatpush.msra.mxu1 %v59_v18  ;;  %204 = vmatpush.msra.mxu3 %v93_v28  ;;  %v53_v42 = vld [vmem:[%s849_s1 + $0x98] sm:$0xff]  ;;  %v72_v43 = vld [vmem:[%s849_s1 + $0x130] sm:$0xff]  ;;  %v71_v47 = vld [vmem:[%s849_s1 + $0x128] sm:$0xff] }
  0x10   :  { %147 = vmatpush.msra.mxu0 %v42_v21  ;;  %185 = vmatpush.msra.mxu2 %v76_v27  ;;  %v89_v44 = vld [vmem:[%s849_s1 + $0x1b8] sm:$0xff]  ;;  %v36_v45 = vld [vmem:[%s849_s1 + $0x10] sm:$0xff]  ;;  %v35_v49 = vld [vmem:[%s849_s1 + $0x8] sm:$0xff] }
  0x11   :  { %167 = vmatpush.msra.mxu1 %v58_v22  ;;  %205 = vmatpush.msra.mxu3 %v92_v32  ;;  %v52_v46 = vld [vmem:[%s849_s1 + $0x90] sm:$0xff]  ;;  %v51_v50 = vld [vmem:[%s849_s1 + $0x88] sm:$0xff]  ;;  %v70_v51 = vld [vmem:[%s849_s1 + $0x120] sm:$0xff] }
  0x12   :  { %148 = vmatpush.msra.mxu0 %v41_v25  ;;  %186 = vmatpush.msra.mxu2 %v75_v31  ;;  %v88_v48 = vld [vmem:[%s849_s1 + $0x1b0] sm:$0xff]  ;;  %v87_v52 = vld [vmem:[%s849_s1 + $0x1a8] sm:$0xff]  ;;  %v34_v53 = vld [vmem:[%s849_s1] sm:$0xff] }
  0x13   :  { %168 = vmatpush.msra.mxu1 %v57_v26  ;;  %206 = vmatpush.msra.mxu3 %v91_v36  ;;  %v50_v54 = vld [vmem:[%s849_s1 + $0x80] sm:$0xff]  ;;  %v113_v55 = vld [vmem:[%s849_s1 + $0x278] sm:$0xff]  ;;  %v112_v59 = vld [vmem:[%s849_s1 + $0x270] sm:$0xff] }
  0x14   :  { %149 = vmatpush.msra.mxu0 %v40_v29  ;;  %187 = vmatpush.msra.mxu2 %v74_v35  ;;  %v129_v56 = vld [vmem:[%s849_s1 + $0x2f8] sm:$0xff]  ;;  %v86_v58 = vld [vmem:[%s849_s1 + $0x1a0] sm:$0xff]  ;;  %v128_v60 = vld [vmem:[%s849_s1 + $0x2f0] sm:$0xff] }
  0x15   :  { %169 = vmatpush.msra.mxu1 %v56_v30  ;;  %207 = vmatpush.msra.mxu3 %v90_v40  ;;  %v69_v57 = vld [vmem:[%s849_s1 + $0x118] sm:$0xff]  ;;  %v68_v61 = vld [vmem:[%s849_s1 + $0x110] sm:$0xff]  ;;  %v111_v63 = vld [vmem:[%s849_s1 + $0x268] sm:$0xff] }
  0x16   :  { %150 = vmatpush.msra.mxu0 %v39_v33  ;;  %188 = vmatpush.msra.mxu2 %v73_v39  ;;  %v85_v62 = vld [vmem:[%s849_s1 + $0x198] sm:$0xff]  ;;  %v127_v0 = vld [vmem:[%s849_s1 + $0x2e8] sm:$0xff]  ;;  %v84_v2 = vld [vmem:[%s849_s1 + $0x190] sm:$0xff] }
  0x17   :  { %170 = vmatpush.msra.mxu1 %v55_v34  ;;  %208 = vmatpush.msra.mxu3 %v89_v44  ;;  %v67_v1 = vld [vmem:[%s849_s1 + $0x108] sm:$0xff]  ;;  %v110_v3 = vld [vmem:[%s849_s1 + $0x260] sm:$0xff]  ;;  %v109_v4 = vld [vmem:[%s849_s1 + $0x258] sm:$0xff] }
  0x18   :  { %151 = vmatpush.msra.mxu0 %v38_v37  ;;  %189 = vmatpush.msra.mxu2 %v72_v43  ;;  %v126_v5 = vld [vmem:[%s849_s1 + $0x2e0] sm:$0xff]  ;;  %v125_v6 = vld [vmem:[%s849_s1 + $0x2d8] sm:$0xff]  ;;  %v83_v8 = vld [vmem:[%s849_s1 + $0x188] sm:$0xff] }
  0x19   :  { %171 = vmatpush.msra.mxu1 %v54_v38  ;;  %209 = vmatpush.msra.mxu3 %v88_v48  ;;  %v66_v7 = vld [vmem:[%s849_s1 + $0x100] sm:$0xff]  ;;  %v29_v9 = vld [vmem:[%s848_s0 + $0x10] sm:$0xff] }
  0x1a   :  { %152 = vmatpush.msra.mxu0 %v37_v41  ;;  %190 = vmatpush.msra.mxu2 %v71_v47  ;;  %v82_v10 = vld [vmem:[%s849_s1 + $0x180] sm:$0xff] }
  0x1b   :  { %172 = vmatpush.msra.mxu1 %v53_v42  ;;  %210 = vmatpush.msra.mxu3 %v87_v52 }
  0x1c   :  { %153 = vmatpush.msra.mxu0 %v36_v45  ;;  %191 = vmatpush.msra.mxu2 %v70_v51 }
  0x1d   :  { %173 = vmatpush.msra.mxu1 %v52_v46  ;;  %211 = vmatpush.msra.mxu3 %v86_v58 }
  0x1e   :  { %154 = vmatpush.msra.mxu0 %v35_v49  ;;  %192 = vmatpush.msra.mxu2 %v69_v57 }
  0x1f   :  { %174 = vmatpush.msra.mxu1 %v51_v50  ;;  %212 = vmatpush.msra.mxu3 %v85_v62 }
  0x20   :  { %155 = vmatpush.msra.mxu0 %v34_v53  ;;  %193 = vmatpush.msra.mxu2 %v68_v61 }
  0x21   :  { %175 = vmatpush.msra.mxu1 %v50_v54  ;;  %213 = vmatpush.msra.mxu3 %v84_v2 }
  0x22   :  { %220 = vmatpush.msrb.mxu0 %v113_v55  ;;  %194 = vmatpush.msra.mxu2 %v67_v1 }
  0x23   :  { %240 = vmatpush.msrb.mxu1 %v129_v56 }
  0x24   :  { %221 = vmatpush.msrb.mxu0 %v112_v59 }
  0x25   :  { %241 = vmatpush.msrb.mxu1 %v128_v60 }
  0x26   :  { %222 = vmatpush.msrb.mxu0 %v111_v63 }
  0x27   :  { %242 = vmatpush.msrb.mxu1 %v127_v0 }
  0x28   :  { %223 = vmatpush.msrb.mxu0 %v110_v3 }
  0x29   :  { %243 = vmatpush.msrb.mxu1 %v126_v5 }
  0x2a   :  { %12 = vsyncpa [#allocation3], 0  ;;  %v108_v11 = vld [vmem:[%s849_s1 + $0x250] sm:$0xff]  ;;  %195 = vmatpush.msra.mxu2 %v66_v7  ;;  %214 = vmatpush.msra.mxu3 %v83_v8  ;;  %v131_v13 = vld [vmem:[%s849_s1 + $0x308] sm:$0xff]  ;;  %vm136_vm0 = vcmask 130048   ;;  %vm334_vm1 = vcmask 523264  }
  0x2b   :  { %v124_v12 = vld [vmem:[%s849_s1 + $0x2d0] sm:$0xff]  ;;  %224 = vmatpush.msrb.mxu0 %v109_v4  ;;  %244 = vmatpush.msrb.mxu1 %v125_v6  ;;  %v27_v14 = vld [vmem:[%s848_s0] sm:$0xff]  ;;  %v107_v15 = vld [vmem:[%s849_s1 + $0x248] sm:$0xff]  ;;  %s408_s29 = smov [#allocation2]   ;;  %vm358_vm2 = vcmask 80896  }
  0x2c   :  { %v123_v16 = vld [vmem:[%s849_s1 + $0x2c8] sm:$0xff]  ;;  %196 = vmatmul.f32.vlgmr.msra.gmra.mxu2 %v29_v9  ;;  %215 = vmatpush.msra.mxu3 %v82_v10  ;;  %v30_v17 = vld [vmem:[%s848_s0 + $0x18] sm:$0xff]  ;;  %v106_v19 = vld [vmem:[%s849_s1 + $0x240] sm:$0xff]  ;;  %s365_s30 = sshll.u32 %s408_s29, 4  ;;  %s366_s30 = int_to_ptr.vmem [resolvable:$true] %s365_s30 }
  0x2d   :  { %225 = vmatpush.msrb.mxu0 %v108_v11  ;;  %245 = vmatpush.msrb.mxu1 %v124_v12  ;;  %v28_v18 = vld [vmem:[%s848_s0 + $0x8] sm:$0xff]  ;;  %v122_v20 = vld [vmem:[%s849_s1 + $0x2c0] sm:$0xff]  ;;  %v296_v22 = vld [vmem:[%s851_s3 + $0x78] sm:$0xff] }
  0x2e   :  { %274 = vmatpush.msrb.mxu2 %v131_v13  ;;  %156 = vmatmul.f32.vlgmr.msra.gmra.mxu0 %v27_v14  ;;  %v130_v21 = vld [vmem:[%s849_s1 + $0x300] sm:$0xff]  ;;  %v105_v23 = vld [vmem:[%s849_s1 + $0x238] sm:$0xff]  ;;  %v33_v25 = vld [vmem:[%s848_s0 + $0x30] sm:$0xff] }
  0x2f   :  { %226 = vmatpush.msrb.mxu0 %v107_v15  ;;  %246 = vmatpush.msrb.mxu1 %v123_v16  ;;  %v121_v24 = vld [vmem:[%s849_s1 + $0x2b8] sm:$0xff]  ;;  %v295_v26 = vld [vmem:[%s851_s3 + $0x70] sm:$0xff]  ;;  %v294_v29 = vld [vmem:[%s851_s3 + $0x68] sm:$0xff] }
  0x30   :  { %216 = vmatmul.f32.vlgmr.msra.gmra.mxu3 %v30_v17  ;;  %176 = vmatmul.f32.vlgmr.msra.gmra.mxu1 %v28_v18  ;;  %v104_v27 = vld [vmem:[%s849_s1 + $0x230] sm:$0xff]  ;;  %v103_v30 = vld [vmem:[%s849_s1 + $0x228] sm:$0xff]  ;;  %v293_v32 = vld [vmem:[%s851_s3 + $0x60] sm:$0xff] }
  0x31   :  { %227 = vmatpush.msrb.mxu0 %v106_v19  ;;  %247 = vmatpush.msrb.mxu1 %v122_v20  ;;  %v120_v28 = vld [vmem:[%s849_s1 + $0x2b0] sm:$0xff]  ;;  %v119_v31 = vld [vmem:[%s849_s1 + $0x2a8] sm:$0xff]  ;;  %v102_v33 = vld [vmem:[%s849_s1 + $0x220] sm:$0xff] }
  0x32   :  { %275 = vmatpush.msrb.mxu2 %v130_v21  ;;  %301 = vmatpush.msrb.mxu3 %v296_v22  ;;  %v118_v34 = vld [vmem:[%s849_s1 + $0x2a0] sm:$0xff]  ;;  %v292_v35 = vld [vmem:[%s851_s3 + $0x58] sm:$0xff]  ;;  %v291_v38 = vld [vmem:[%s851_s3 + $0x50] sm:$0xff] }
  0x33   :  { %228 = vmatpush.msrb.mxu0 %v105_v23  ;;  %248 = vmatpush.msrb.mxu1 %v121_v24  ;;  %v101_v36 = vld [vmem:[%s849_s1 + $0x218] sm:$0xff]  ;;  %v100_v39 = vld [vmem:[%s849_s1 + $0x210] sm:$0xff]  ;;  %v290_v41 = vld [vmem:[%s851_s3 + $0x48] sm:$0xff] }
  0x34   :  { %376 = vmatmul.msk.f32.vlgmr.msrb.gmra.mxu2 %vm136_vm0, %v33_v25  ;;  %302 = vmatpush.msrb.mxu3 %v295_v26  ;;  %v117_v37 = vld [vmem:[%s849_s1 + $0x298] sm:$0xff]  ;;  %v116_v40 = vld [vmem:[%s849_s1 + $0x290] sm:$0xff]  ;;  %v99_v42 = vld [vmem:[%s849_s1 + $0x208] sm:$0xff] }
  0x35   :  { %229 = vmatpush.msrb.mxu0 %v104_v27  ;;  %249 = vmatpush.msrb.mxu1 %v120_v28  ;;  %v115_v43 = vld [vmem:[%s849_s1 + $0x288] sm:$0xff]  ;;  %v98_v44 = vld [vmem:[%s849_s1 + $0x200] sm:$0xff]  ;;  %v288_v49 = vld [vmem:[%s851_s3 + $0x38] sm:$0xff] }
  0x36   :  { %303 = vmatpush.msrb.mxu3 %v294_v29  ;;  %v114_v45 = vld [vmem:[%s849_s1 + $0x280] sm:$0xff]  ;;  %v32_v47 = vld [vmem:[%s848_s0 + $0x28] sm:$0xff]  ;;  %v287_v50 = vld [vmem:[%s851_s3 + $0x30] sm:$0xff] }
  0x37   :  { %230 = vmatpush.msrb.mxu0 %v103_v30  ;;  %250 = vmatpush.msrb.mxu1 %v119_v31  ;;  %v31_v46 = vld [vmem:[%s848_s0 + $0x20] sm:$0xff]  ;;  %v286_v51 = vld [vmem:[%s851_s3 + $0x28] sm:$0xff]  ;;  %v284_v53 = vld [vmem:[%s851_s3 + $0x18] sm:$0xff] }
  0x38   :  { %304 = vmatpush.msrb.mxu3 %v293_v32  ;;  %v289_v48 = vld [vmem:[%s851_s3 + $0x40] sm:$0xff]  ;;  %v283_v54 = vld [vmem:[%s851_s3 + $0x10] sm:$0xff]  ;;  %v282_v55 = vld [vmem:[%s851_s3 + $0x8] sm:$0xff] }
  0x39   :  { %231 = vmatpush.msrb.mxu0 %v102_v33  ;;  %251 = vmatpush.msrb.mxu1 %v118_v34  ;;  %v285_v52 = vld [vmem:[%s851_s3 + $0x20] sm:$0xff]  ;;  %v329_v57 = vld [vmem:[%s853_s5 + $0x38] sm:$0xff]  ;;  %v328_v58 = vld [vmem:[%s853_s5 + $0x30] sm:$0xff] }
  0x3a   :  { %305 = vmatpush.msrb.mxu3 %v292_v35  ;;  %v281_v56 = vld [vmem:[%s851_s3] sm:$0xff]  ;;  %346 = vmatpush.msra.mxu2 %v329_v57  ;;  %v327_v59 = vld [vmem:[%s853_s5 + $0x28] sm:$0xff]  ;;  %v325_v63 = vld [vmem:[%s853_s5 + $0x18] sm:$0xff] }
  0x3b   :  { %232 = vmatpush.msrb.mxu0 %v101_v36  ;;  %252 = vmatpush.msrb.mxu1 %v117_v37  ;;  %v379_v60 = vld [vmem:[%s850_s2] ss:$0 sm:$0xff]  ;;  %v324_v14 = vld [vmem:[%s853_s5 + $0x10] sm:$0xff]  ;;  %v323_v15 = vld [vmem:[%s853_s5 + $0x8] sm:$0xff] }
  0x3c   :  { %306 = vmatpush.msrb.mxu3 %v291_v38  ;;  %347 = vmatpush.msra.mxu2 %v328_v58  ;;  %v326_v61 = vld [vmem:[%s853_s5 + $0x20] sm:$0xff] }
  0x3d   :  { %233 = vmatpush.msrb.mxu0 %v100_v39  ;;  %253 = vmatpush.msrb.mxu1 %v116_v40  ;;  %v322_v16 = vld [vmem:[%s853_s5] sm:$0xff]  ;;  %s367_s5 = sshll.u32 %s855_s7, 4  ;;  %s368_s5 = int_to_ptr.hbm [resolvable:$true] %s367_s5 }
  0x3e   :  { %307 = vmatpush.msrb.mxu3 %v290_v41  ;;  %348 = vmatpush.msra.mxu2 %v327_v59  ;;  %v380_v17 = vld [vmem:[%s852_s4] ss:$0 sm:$0xff] }
  0x3f   :  { %234 = vmatpush.msrb.mxu0 %v99_v42  ;;  %254 = vmatpush.msrb.mxu1 %v115_v43  ;;  %v381_v21 = vld [vmem:[%s854_s6] ss:$0 sm:$0xff] }
  0x40   :  { %308 = vmatpush.msrb.mxu3 %v289_v48  ;;  %349 = vmatpush.msra.mxu2 %v326_v61 }
  0x41   :  { %235 = vmatpush.msrb.mxu0 %v98_v44  ;;  %255 = vmatpush.msrb.mxu1 %v114_v45 }
  0x42   :  { %236 = vmatmul.f32.vlgmr.msrb.gmra.mxu0 %v31_v46  ;;  %256 = vmatmul.f32.vlgmr.msrb.gmra.mxu1 %v32_v47 }
  0x43   :  { %309 = vmatpush.msrb.mxu3 %v288_v49  ;;  %350 = vmatpush.msra.mxu2 %v325_v63 }
  0x45   :  { %310 = vmatpush.msrb.mxu3 %v287_v50  ;;  %351 = vmatpush.msra.mxu2 %v324_v14 }
  0x47   :  { %311 = vmatpush.msrb.mxu3 %v286_v51  ;;  %352 = vmatpush.msra.mxu2 %v323_v15 }
  0x49   :  { %312 = vmatpush.msrb.mxu3 %v285_v52  ;;  %353 = vmatpush.msra.mxu2 %v322_v16 }
  0x4b   :  { %313 = vmatpush.msrb.mxu3 %v284_v53 }
  0x4d   :  { %314 = vmatpush.msrb.mxu3 %v283_v54 }
  0x4f   :  { %315 = vmatpush.msrb.mxu3 %v282_v55 }
  0x51   :  { %316 = vmatpush.msrb.mxu3 %v281_v56 }
  0xab   :  { %v157_v62 = vpop.f32.mrf.mxu0 }
  0xac   :  { %v158_v0 = vadd.f32 %v379_v60, %v157_v62 }
  0xad   :  { %v177_v1 = vpop.f32.mrf.mxu1 }
  0xae   :  { %v178_v2 = vadd.f32 %v177_v1, %v158_v0 }
  0xaf   :  { %v197_v3 = vpop.f32.mrf.mxu2 }
  0xb0   :  { %v198_v4 = vadd.f32 %v197_v3, %v178_v2 }
  0xb3   :  { %v217_v5 = vpop.f32.mrf.mxu3 }
  0xb4   :  { %v218_v6 = vadd.f32 %v217_v5, %v198_v4 }
  0xb7   :  { %v277_v10 = vpop.f32.mrf.mxu2 }
  0xbf   :  { %v237_v7 = vpop.f32.mrf.mxu0  ;;  %v257_v8 = vpop.f32.mrf.mxu1 }
  0xc0   :  { %v238_v9 = vadd.f32 %v237_v7, %v218_v6 }
  0xc2   :  { %v258_v11 = vadd.f32 %v257_v8, %v238_v9 }
  0xc4   :  { %v278_v12 = vadd.f32 %v277_v10, %v258_v11 }
  0xc6   :  { %v280_v13 = vmax.f32 %v278_v12, 0.0 }
  0xc8   :  { %317 = vmatmul.f32.vlgmr.msrb.gmra.mxu3 %v280_v13 }
 0x14b   :  { %v318_v18 = vpop.f32.mrf.mxu3 }
 0x14c   :  { %v319_v19 = vadd.f32 %v380_v17, %v318_v18 }
 0x14e   :  { %v321_v20 = vmax.f32 %v319_v19, 0.0 }
 0x150   :  { %377 = vmatmul.msk.f32.vlgmr.msra.gmra.mxu2 %vm334_vm1, %v321_v20 }
 0x1d3   :  { %v355_v22 = vpop.f32.mrf.mxu2 }
 0x1d4   :  { %v356_v23 = vadd.f32 %v381_v21, %v355_v22 }
 0x1d6   :  { %359 = vst.msk [vmem:[#allocation2] sm:$0xff] %vm358_vm2, %v356_v23 }
 0x1d7   :  { %370 = dma.vmem_to_hbm [thread:$0]  %s366_s30, 128, %s368_s5, [#allocation3]  }
 0x1d8   :  { %406 = dma.done.wait [#allocation3], 128  }
 0x1d9   :  { %407 = vsyncadd [#allocation3], 4294967168 }
 0x1da   :  { %375 = vsyncpa [#allocation3], 1 }

</bundles_post_ra>
